<compile_context>
chip_gen: v6e
topology: v6e:2x2x1
jax: 0.10.0
libtpu: 0.0.40
codegen_flags: <defaults>
</compile_context>

<pallas_src>
import functools

import numpy as np
import jax
import jax.numpy as jnp
from jax.experimental import pallas as pl
from jax.experimental.pallas import tpu as pltpu

LANES = 128
SUBLANES = 8
Y_SUBLANES = 32                  # int8 sublane packing: 32 rows per native tile
MAX_ROW_TILE = 4096              # 4096 rows x 128 lanes = 524288 pixels / grid step
MAX_SUB_ROWS = 256               # compute granularity inside one grid step


def _wce_stats_kernel(x_ref, y_ref, o_ref, *, rows, row_tile, sub_rows,
                      ragged, has_pad):
    """One (batch, group, row-tile) step of weighted-CE statistics.

    x_ref : (1, 2, row_tile, 128)  logits, native dtype (f32 or bf16)
    y_ref : (1, row_tile, 128)     int8 targets in {0, 1}; -1 = padding
    o_ref : (1, 3, 8, 128)         f32 partial stats, accumulated across the
                                   row-tile grid axis:
                                   [count(y==1), sum ce (valid), sum ce|y==1]
    """
    j = pl.program_id(2)

    @pl.when(j == 0)
    def _init():
        o_ref[...] = jnp.zeros_like(o_ref)

    n_sub = row_tile // sub_rows

    def fold(v):
        # (sub_rows, 128) -> (8, 128): grouping consecutive sublanes; pure
        # vreg-wise VPU adds, no cross-lane (XLU) work inside the kernel.
        return v.reshape(sub_rows // SUBLANES, SUBLANES, LANES).sum(axis=0)

    def body(s, carry):
        a_n1, a_sall, a_s1 = carry
        r0 = pl.multiple_of(s * sub_rows, sub_rows)

        # Upcast on load: bf16 / int8 are bandwidth formats only.
        x0 = x_ref[0, 0, pl.ds(r0, sub_rows), :].astype(jnp.float32)
        x1 = x_ref[0, 1, pl.ds(r0, sub_rows), :].astype(jnp.float32)
        y = y_ref[0, pl.ds(r0, sub_rows), :].astype(jnp.int32)

        is1 = y == 1
        # 2-class CE closed form: ce = -log softmax(x)[y] = softplus(x_other -
        # x_picked); stable form max(z,0) + log(1 + exp(-|z|)).
        z = jnp.where(is1, x0 - x1, x1 - x0)
        ce = jnp.maximum(z, 0.0) + jnp.log(1.0 + jnp.exp(-jnp.abs(z)))

        if ragged:
            # Row-validity mask: only needed when the last tile reads OOB rows.
            row_ids = (j * row_tile + r0 +
                       jax.lax.broadcasted_iota(jnp.int32, (sub_rows, LANES), 0))
            row_ok = row_ids < rows
        else:
            row_ok = None

        m1 = is1 if row_ok is None else jnp.logical_and(is1, row_ok)
        if has_pad:
            vmask = y >= 0                      # exclude explicit -1 padding
            if row_ok is not None:
                vmask = jnp.logical_and(vmask, row_ok)
        else:
            vmask = row_ok

        # Select (never multiply) so NaN/inf from garbage OOB rows cannot leak.
        ce1 = jnp.where(m1, ce, 0.0)
        ce_all = ce if vmask is None else jnp.where(vmask, ce, 0.0)

        return (a_n1 + fold(m1.astype(jnp.float32)),
                a_sall + fold(ce_all),
                a_s1 + fold(ce1))

    zeros = jnp.zeros((SUBLANES, LANES), jnp.float32)
    a_n1, a_sall, a_s1 = jax.lax.fori_loop(0, n_sub, body, (zeros, zeros, zeros))

    o_ref[0, 0] += a_n1
    o_ref[0, 1] += a_sall
    o_ref[0, 2] += a_s1


def _wce_stats(x, y, *, max_row_tile=MAX_ROW_TILE):
    """x: (B, 2, H, W) logits (any float dtype, NCHW); y: (B, H, W) int targets.

    Returns f32 scalars (n_valid, n1, s_all, s1):
      n_valid = number of labelled pixels (static), n1 = #(y==1),
      s_all = sum of per-pixel CE over valid pixels, s1 = sum of CE over y==1.
    """
    B, C, H, W = x.shape
    assert C == 2, "binary-class setting"
    HW = H * W

    xr = x.reshape(B, C, HW)                          # free reshape, no transpose
    yr = y.reshape(B, HW).astype(jnp.int8)            # 1 B/pixel over HBM

    chunk = Y_SUBLANES * LANES                        # 4096 px: int8 row tiling
    hw_pad = (-HW) % chunk
    if hw_pad:
        # Only tiny deep-supervision scales / odd sizes hit this copy.
        xr = jnp.pad(xr, ((0, 0), (0, 0), (0, hw_pad)))
        yr = jnp.pad(yr, ((0, 0), (0, hw_pad)), constant_values=-1)
    rows = (HW + hw_pad) // LANES                     # multiple of 32

    # v7x megacore: if the batch axis alone cannot feed both TensorCores, add a
    # parallel "group" axis over row segments (exact splits only).
    groups = 2 if (B == 1 and rows % (2 * Y_SUBLANES) == 0) else 1
    seg_rows = rows // groups
    row_tile = min(seg_rows, max_row_tile)
    if groups > 1 and seg_rows % row_tile:
        groups, seg_rows = 1, rows                    # fall back: keep index math exact
        row_tile = min(seg_rows, max_row_tile)
    tiles = pl.cdiv(seg_rows, row_tile)               # per group
    ragged = bool(seg_rows % row_tile)                # only possible when groups == 1
    blocks_per_group = seg_rows // row_tile           # exact whenever groups > 1

    sub_rows = row_tile
    for cand in (MAX_SUB_ROWS, 128, 64, 32):
        if row_tile % cand == 0:
            sub_rows = cand
            break

    xd = xr.reshape(B, C, rows, LANES)                # native dtype into the kernel
    yd = yr.reshape(B, rows, LANES)

    kernel = functools.partial(
        _wce_stats_kernel, rows=rows, row_tile=row_tile, sub_rows=sub_rows,
        ragged=ragged, has_pad=bool(hw_pad))

    out = pl.pallas_call(
        kernel,
        out_shape=jax.ShapeDtypeStruct((B * groups, 3, SUBLANES, LANES), jnp.float32),
        grid_spec=pltpu.PrefetchScalarGridSpec(
            num_scalar_prefetch=0,
            grid=(B, groups, tiles),
            in_specs=[
                pl.BlockSpec((1, C, row_tile, LANES),
                             lambda b, g, j: (b, 0, g * blocks_per_group + j, 0)),
                pl.BlockSpec((1, row_tile, LANES),
                             lambda b, g, j: (b, g * blocks_per_group + j, 0)),
            ],
            out_specs=pl.BlockSpec((1, 3, SUBLANES, LANES),
                                   lambda b, g, j: (b * groups + g, 0, 0, 0)),
        ),
        compiler_params=pltpu.CompilerParams(
            dimension_semantics=("parallel", "parallel", "arbitrary"),
            vmem_limit_bytes=32 * 1024 * 1024),
    )(xd, yd)

    # Final cross-lane reductions + scalar glue in JAX (fused under jit).
    part = jnp.sum(out, axis=(0, 2, 3))               # (3,): [n1, s_all, s1]
    n_valid = jnp.float32(B * HW)                     # exact, known statically
    return n_valid, part[0], part[1], part[2]


def weighted_bce_loss(x, y, disable_auto_weight=False, max_row_tile=MAX_ROW_TILE):
    """Equivalent of self.loss(x, y, weight=class_weights) with auto fg weight."""
    n_valid, n1, s_all, s1 = _wce_stats(x, y, max_row_tile=max_row_tile)
    if disable_auto_weight:
        return s_all / n_valid                        # plain (unweighted) CE mean
    # Class-0 stats by subtraction; counts/sums stay far below f32 precision
    # limits (2^24) for realistic segmentation sizes.
    n0 = n_valid - n1
    s0 = s_all - s1
    eps = jnp.float32(1e-6)
    max_fg_weight = jnp.float32(1e6)
    fg_weight = jnp.minimum(n0 / (n1 + eps), max_fg_weight)
    # PyTorch weighted CE 'mean': sum(w[y]*ce) / sum(w[y])
    return (s0 + fg_weight * s1) / (n0 + fg_weight * n1)


# jit the whole per-scale loss: fuses reshape/pad prep, final reductions and
# the fg-weight scalar glue with the pallas_call.
_weighted_bce_loss_jit = jax.jit(
    weighted_bce_loss, static_argnames=("disable_auto_weight", "max_row_tile"))


class MultipleOutputLoss2:
    """JAX/Pallas port of lib/utils/losses.py::MultipleOutputLoss2."""

    def __init__(self, weight_factors=None, use_ce_loss=True):
        self.weight_factors = weight_factors
        self.use_ce_loss = use_ce_loss
        # TODO(synk): pixel_weights (pixel-level weight map) path is not
        # implemented — the base loss with a pixel weight map is not specified
        # by the reference module.
        # TODO(synk): all deep-supervision scales could be fused into a single
        # pallas_call via scalar-prefetch offsets; kept per-scale (each scale is
        # already one fused kernel + tiny scalar glue).

    def compute_loss(self, x, y, pixel_weights=None, disable_auto_weight=False,
                     per_sample_cal=False):
        assert pixel_weights is None, "pixel_weights not supported"
        if per_sample_cal and not disable_auto_weight:
            per = [_weighted_bce_loss_jit(x[b:b + 1], y[b:b + 1],
                                          disable_auto_weight=False)
                   for b in range(x.shape[0])]
            return sum(per) / len(per)
        return _weighted_bce_loss_jit(x, y,
                                      disable_auto_weight=disable_auto_weight)

    def __call__(self, x, y, pixel_weights=None, disable_auto_weight=False):
        assert isinstance(x, (tuple, list)), 'x must be either tuple or list'
        assert isinstance(y, (tuple, list)), 'y must be either tuple or list'
        if self.weight_factors is None:
            weights = [1] * len(x)
        else:
            weights = self.weight_factors
        if self.use_ce_loss:
            y = [it[:, 0, ...] for it in y]           # drop channel dim of targets

        losses, loss_names = [], []
        l = weights[0] * self.compute_loss(
            x[0], y[0], pixel_weights=pixel_weights,
            disable_auto_weight=disable_auto_weight)
        losses.append(l)
        loss_names.append('d0')
        for i in range(1, len(x)):
            if weights[i] != 0:
                loss = weights[i] * self.compute_loss(
                    x[i], y[i], pixel_weights=pixel_weights,
                    disable_auto_weight=disable_auto_weight)
                if l.shape == loss.shape:
                    l = l + loss
                losses.append(loss)
                loss_names.append('d%d' % i)
        return ([l] + losses, ['loss'] + loss_names)


def _ref_single_loss(x, y_full, disable_auto_weight=False):
    """Pure-JAX reference of compute_loss (weighted CE, auto class weights)."""
    y = y_full[:, 0, ...]
    logp = jax.nn.log_softmax(x.astype(jnp.float32), axis=1)
    ce = -jnp.take_along_axis(logp, y[:, None, ...].astype(jnp.int32), axis=1)[:, 0]
    if disable_auto_weight:
        return jnp.mean(ce)
    n0 = jnp.sum(y == 0).astype(jnp.float32)
    n1 = jnp.sum(y == 1).astype(jnp.float32)
    fg = jnp.minimum(n0 / (n1 + 1e-6), 1e6)
    w = jnp.where(y == 1, fg, 1.0).astype(jnp.float32)
    return jnp.sum(w * ce) / jnp.sum(w)


if __name__ == "__main__":
    key = jax.random.PRNGKey(0)
    ks = jax.random.split(key, 8)

    # Two deep-supervision scales through the module API (B=2, C=2).
    x0 = jax.random.normal(ks[0], (2, 2, 16, 16), dtype=jnp.float32)
    x1 = jax.random.normal(ks[1], (2, 2, 8, 8), dtype=jnp.float32)
    y0 = jax.random.bernoulli(ks[2], p=0.3, shape=(2, 1, 16, 16)).astype(jnp.int32)
    y1 = jax.random.bernoulli(ks[3], p=0.3, shape=(2, 1, 8, 8)).astype(jnp.int32)

    loss_fn = MultipleOutputLoss2(weight_factors=None, use_ce_loss=True)
    losses, names = loss_fn([x0, x1], [y0, y1])
    losses = [jax.block_until_ready(v) for v in losses]

    ref_d0 = _ref_single_loss(x0, y0)
    ref_d1 = _ref_single_loss(x1, y1)
    assert names == ['loss', 'd0', 'd1']
    np.testing.assert_allclose(np.array(losses[1]), np.array(ref_d0), rtol=1e-4, atol=1e-5)
    np.testing.assert_allclose(np.array(losses[2]), np.array(ref_d1), rtol=1e-4, atol=1e-5)
    np.testing.assert_allclose(np.array(losses[0]), np.array(ref_d0 + ref_d1),
                               rtol=1e-4, atol=1e-5)

    # B=1 path (extra parallel "group" axis so v7x's second TensorCore gets work).
    x2 = jax.random.normal(ks[4], (1, 2, 128, 128), dtype=jnp.float32)
    y2 = jax.random.bernoulli(ks[5], p=0.2, shape=(1, 1, 128, 128)).astype(jnp.int32)
    got_b1 = jax.block_until_ready(loss_fn.compute_loss(x2, y2[:, 0]))
    np.testing.assert_allclose(np.array(got_b1), np.array(_ref_single_loss(x2, y2)),
                               rtol=1e-4, atol=1e-5)

    # Ragged last row-tile path (forced via a small max_row_tile) + bf16 logits.
    x3 = jax.random.normal(ks[6], (2, 2, 96, 128),
                           dtype=jnp.float32).astype(jnp.bfloat16)
    y3 = jax.random.bernoulli(ks[7], p=0.4, shape=(2, 1, 96, 128)).astype(jnp.int32)
    got_ragged = jax.block_until_ready(
        weighted_bce_loss(x3, y3[:, 0], max_row_tile=64))
    np.testing.assert_allclose(np.array(got_ragged), np.array(_ref_single_loss(x3, y3)),
                               rtol=1e-4, atol=1e-5)

    # disable_auto_weight path (plain unweighted CE mean).
    got_plain = jax.block_until_ready(
        loss_fn.compute_loss(x0, y0[:, 0], disable_auto_weight=True))
    np.testing.assert_allclose(
        np.array(got_plain),
        np.array(_ref_single_loss(x0, y0, disable_auto_weight=True)),
        rtol=1e-4, atol=1e-5)

    print("KERNEL_OK")
</pallas_src>

<mosaic_0001>
module attributes {stable_mosaic.version = 11 : i64} {
  func.func @_wce_stats_kernel(%arg0: i32, %arg1: i32, %arg2: i32, %arg3: memref<1x2x32x128xf32, #tpu.memory_space<vmem>>, %arg4: memref<1x32x128xi8, #tpu.memory_space<vmem>>, %arg5: memref<1x3x8x128xf32, #tpu.memory_space<vmem>>) attributes {dimension_semantics = [#tpu.dimension_semantics<parallel>, #tpu.dimension_semantics<parallel>, #tpu.dimension_semantics<arbitrary>], iteration_bounds = array<i64: 2, 1, 1>, scalar_prefetch = 0 : i64, scratch_operands = 0 : i64, tpu.core_type = #tpu.core_type<tc>, window_params = [{transform_indices = @transform_0, window_bounds = array<i64: 1, 2, 32, 128>}, {transform_indices = @transform_1, window_bounds = array<i64: 1, 32, 128>}, {transform_indices = @transform_2, window_bounds = array<i64: 1, 3, 8, 128>}]} {
    %c0_i32 = arith.constant 0 : i32
    %0 = arith.cmpi eq, %arg2, %c0_i32 : i32
    %1 = arith.extui %0 : i1 to i32
    %c0_i32_0 = arith.constant 0 : i32
    %2 = arith.cmpi ne, %1, %c0_i32_0 : i32
    scf.if %2 {
      %cst_41 = arith.constant 0.000000e+00 : f32
      %66 = vector.broadcast %cst_41 : f32 to vector<1x3x8x128xf32>
      %c0_42 = arith.constant 0 : index
      %c0_43 = arith.constant 0 : index
      %c0_44 = arith.constant 0 : index
      %c0_45 = arith.constant 0 : index
      %67 = vector.load %arg5[%c0_42, %c0_43, %c0_44, %c0_45] : memref<1x3x8x128xf32, #tpu.memory_space<vmem>>, vector<1x3x8x128xf32>
      tpu.vector_store %arg5[%c0_42, %c0_43, %c0_44, %c0_45], %66 {strides = array<i32>} : memref<1x3x8x128xf32, #tpu.memory_space<vmem>>, vector<1x3x8x128xf32>,
    } else {
    }
    %cst = arith.constant 0.000000e+00 : f32
    %3 = vector.broadcast %cst : f32 to vector<8x128xf32>
    %c0_i32_1 = arith.constant 0 : i32
    %c32_i32 = arith.constant 32 : i32
    %4 = arith.muli %c0_i32_1, %c32_i32 : i32
    %5 = tpu.assume_multiple %4, 32 : i32
    %c0 = arith.constant 0 : index
    %c0_2 = arith.constant 0 : index
    %6 = arith.index_cast %5 : i32 to index
    %c0_3 = arith.constant 0 : index
    %7 = vector.load %arg3[%c0, %c0_2, %6, %c0_3] : memref<1x2x32x128xf32, #tpu.memory_space<vmem>>, vector<1x1x32x128xf32>
    %8 = vector.shape_cast %7 : vector<1x1x32x128xf32> to vector<32x128xf32>
    %c0_4 = arith.constant 0 : index
    %c1 = arith.constant 1 : index
    %9 = arith.index_cast %5 : i32 to index
    %c0_5 = arith.constant 0 : index
    %10 = vector.load %arg3[%c0_4, %c1, %9, %c0_5] : memref<1x2x32x128xf32, #tpu.memory_space<vmem>>, vector<1x1x32x128xf32>
    %11 = vector.shape_cast %10 : vector<1x1x32x128xf32> to vector<32x128xf32>
    %c0_6 = arith.constant 0 : index
    %12 = arith.index_cast %5 : i32 to index
    %c0_7 = arith.constant 0 : index
    %13 = vector.load %arg4[%c0_6, %12, %c0_7] : memref<1x32x128xi8, #tpu.memory_space<vmem>>, vector<1x32x128xi8>
    %14 = vector.shape_cast %13 : vector<1x32x128xi8> to vector<32x128xi8>
    %15 = arith.extsi %14 : vector<32x128xi8> to vector<32x128xi32>
    %c1_i32 = arith.constant 1 : i32
    %16 = vector.broadcast %c1_i32 : i32 to vector<32x128xi32>
    %17 = arith.cmpi eq, %15, %16 : vector<32x128xi32>
    %18 = arith.subf %8, %11 : vector<32x128xf32>
    %19 = arith.subf %11, %8 : vector<32x128xf32>
    %20 = arith.select %17, %18, %19 : vector<32x128xi1>, vector<32x128xf32>
    %cst_8 = arith.constant 0.000000e+00 : f32
    %21 = vector.broadcast %cst_8 : f32 to vector<32x128xf32>
    %22 = arith.maximumf %20, %21 : vector<32x128xf32>
    %23 = math.absf %20 : vector<32x128xf32>
    %cst_9 = arith.constant 0.000000e+00 : f32
    %24 = vector.broadcast %cst_9 : f32 to vector<32x128xf32>
    %25 = arith.subf %24, %23 : vector<32x128xf32>
    %26 = math.exp %25 : vector<32x128xf32>
    %cst_10 = arith.constant 1.000000e+00 : f32
    %27 = vector.broadcast %cst_10 : f32 to vector<32x128xf32>
    %28 = arith.addf %27, %26 : vector<32x128xf32>
    %29 = math.log %28 : vector<32x128xf32>
    %30 = arith.addf %22, %29 : vector<32x128xf32>
    %c0_i32_11 = arith.constant 0 : i32
    %31 = vector.broadcast %c0_i32_11 : i32 to vector<32x128xi32>
    %32 = arith.cmpi sge, %15, %31 : vector<32x128xi32>
    %cst_12 = arith.constant 0.000000e+00 : f32
    %33 = vector.broadcast %cst_12 : f32 to vector<32x128xf32>
    %34 = arith.select %17, %30, %33 : vector<32x128xi1>, vector<32x128xf32>
    %cst_13 = arith.constant 0.000000e+00 : f32
    %35 = vector.broadcast %cst_13 : f32 to vector<32x128xf32>
    %36 = arith.select %32, %30, %35 : vector<32x128xi1>, vector<32x128xf32>
    %37 = arith.extui %17 : vector<32x128xi1> to vector<32x128xi32>
    %38 = arith.sitofp %37 : vector<32x128xi32> to vector<32x128xf32>
    %39 = vector.shape_cast %38 : vector<32x128xf32> to vector<4x8x128xf32>
    %cst_14 = arith.constant dense<0.000000e+00> : vector<8x128xf32>
    %40 = vector.multi_reduction <add>, %39, %cst_14 [0] : vector<4x8x128xf32> to vector<8x128xf32>
    %41 = arith.addf %3, %40 : vector<8x128xf32>
    %42 = vector.shape_cast %36 : vector<32x128xf32> to vector<4x8x128xf32>
    %cst_15 = arith.constant dense<0.000000e+00> : vector<8x128xf32>
    %43 = vector.multi_reduction <add>, %42, %cst_15 [0] : vector<4x8x128xf32> to vector<8x128xf32>
    %44 = arith.addf %3, %43 : vector<8x128xf32>
    %45 = vector.shape_cast %34 : vector<32x128xf32> to vector<4x8x128xf32>
    %cst_16 = arith.constant dense<0.000000e+00> : vector<8x128xf32>
    %46 = vector.multi_reduction <add>, %45, %cst_16 [0] : vector<4x8x128xf32> to vector<8x128xf32>
    %47 = arith.addf %3, %46 : vector<8x128xf32>
    %c1_i32_17 = arith.constant 1 : i32
    %c0_18 = arith.constant 0 : index
    %c0_19 = arith.constant 0 : index
    %c0_20 = arith.constant 0 : index
    %c0_21 = arith.constant 0 : index
    %48 = vector.load %arg5[%c0_18, %c0_19, %c0_20, %c0_21] : memref<1x3x8x128xf32, #tpu.memory_space<vmem>>, vector<1x1x8x128xf32>
    %49 = vector.shape_cast %48 : vector<1x1x8x128xf32> to vector<8x128xf32>
    %50 = arith.addf %49, %41 : vector<8x128xf32>
    %c0_22 = arith.constant 0 : index
    %c0_23 = arith.constant 0 : index
    %c0_24 = arith.constant 0 : index
    %c0_25 = arith.constant 0 : index
    %51 = vector.load %arg5[%c0_22, %c0_23, %c0_24, %c0_25] : memref<1x3x8x128xf32, #tpu.memory_space<vmem>>, vector<1x1x8x128xf32>
    %52 = vector.shape_cast %51 : vector<1x1x8x128xf32> to vector<8x128xf32>
    %53 = vector.shape_cast %50 : vector<8x128xf32> to vector<1x1x8x128xf32>
    tpu.vector_store %arg5[%c0_22, %c0_23, %c0_24, %c0_25], %53 {strides = array<i32>} : memref<1x3x8x128xf32, #tpu.memory_space<vmem>>, vector<1x1x8x128xf32>,
    %c0_26 = arith.constant 0 : index
    %c1_27 = arith.constant 1 : index
    %c0_28 = arith.constant 0 : index
    %c0_29 = arith.constant 0 : index
    %54 = vector.load %arg5[%c0_26, %c1_27, %c0_28, %c0_29] : memref<1x3x8x128xf32, #tpu.memory_space<vmem>>, vector<1x1x8x128xf32>
    %55 = vector.shape_cast %54 : vector<1x1x8x128xf32> to vector<8x128xf32>
    %56 = arith.addf %55, %44 : vector<8x128xf32>
    %c0_30 = arith.constant 0 : index
    %c1_31 = arith.constant 1 : index
    %c0_32 = arith.constant 0 : index
    %c0_33 = arith.constant 0 : index
    %57 = vector.load %arg5[%c0_30, %c1_31, %c0_32, %c0_33] : memref<1x3x8x128xf32, #tpu.memory_space<vmem>>, vector<1x1x8x128xf32>
    %58 = vector.shape_cast %57 : vector<1x1x8x128xf32> to vector<8x128xf32>
    %59 = vector.shape_cast %56 : vector<8x128xf32> to vector<1x1x8x128xf32>
    tpu.vector_store %arg5[%c0_30, %c1_31, %c0_32, %c0_33], %59 {strides = array<i32>} : memref<1x3x8x128xf32, #tpu.memory_space<vmem>>, vector<1x1x8x128xf32>,
    %c0_34 = arith.constant 0 : index
    %c2 = arith.constant 2 : index
    %c0_35 = arith.constant 0 : index
    %c0_36 = arith.constant 0 : index
    %60 = vector.load %arg5[%c0_34, %c2, %c0_35, %c0_36] : memref<1x3x8x128xf32, #tpu.memory_space<vmem>>, vector<1x1x8x128xf32>
    %61 = vector.shape_cast %60 : vector<1x1x8x128xf32> to vector<8x128xf32>
    %62 = arith.addf %61, %47 : vector<8x128xf32>
    %c0_37 = arith.constant 0 : index
    %c2_38 = arith.constant 2 : index
    %c0_39 = arith.constant 0 : index
    %c0_40 = arith.constant 0 : index
    %63 = vector.load %arg5[%c0_37, %c2_38, %c0_39, %c0_40] : memref<1x3x8x128xf32, #tpu.memory_space<vmem>>, vector<1x1x8x128xf32>
    %64 = vector.shape_cast %63 : vector<1x1x8x128xf32> to vector<8x128xf32>
    %65 = vector.shape_cast %62 : vector<8x128xf32> to vector<1x1x8x128xf32>
    tpu.vector_store %arg5[%c0_37, %c2_38, %c0_39, %c0_40], %65 {strides = array<i32>} : memref<1x3x8x128xf32, #tpu.memory_space<vmem>>, vector<1x1x8x128xf32>,
    return
  }
  func.func @transform_0(%arg0: i32, %arg1: i32, %arg2: i32) -> (i32, i32, i32, i32) {
    %c1_i32 = arith.constant 1 : i32
    %0 = arith.muli %arg1, %c1_i32 : i32
    %1 = arith.addi %0, %arg2 : i32
    %c0_i32 = arith.constant 0 : i32
    %c0_i32_0 = arith.constant 0 : i32
    %c0_i32_1 = arith.constant 0 : i32
    return %arg0, %c0_i32, %1, %c0_i32_0 : i32, i32, i32, i32
  }
  func.func @transform_1(%arg0: i32, %arg1: i32, %arg2: i32) -> (i32, i32, i32) {
    %c1_i32 = arith.constant 1 : i32
    %0 = arith.muli %arg1, %c1_i32 : i32
    %1 = arith.addi %0, %arg2 : i32
    %c0_i32 = arith.constant 0 : i32
    %c0_i32_0 = arith.constant 0 : i32
    return %arg0, %1, %c0_i32 : i32, i32, i32
  }
  func.func @transform_2(%arg0: i32, %arg1: i32, %arg2: i32) -> (i32, i32, i32, i32) {
    %c1_i32 = arith.constant 1 : i32
    %0 = arith.muli %arg0, %c1_i32 : i32
    %1 = arith.addi %0, %arg1 : i32
    %c0_i32 = arith.constant 0 : i32
    %c0_i32_0 = arith.constant 0 : i32
    %c0_i32_1 = arith.constant 0 : i32
    %c0_i32_2 = arith.constant 0 : i32
    return %1, %c0_i32, %c0_i32_0, %c0_i32_1 : i32, i32, i32, i32
  }
}

</mosaic_0001>

<bundles_post_ra>
// kernel: weighted_bce_loss.1
= control target key start
LH: loop header
LB: loop body
LE: loop exit
PB: predicated region body
PF: predicated region fallthrough
CT: control target
= control target key end

     0   :  { %s541_s9 = smov 0   ;;  %s543_s10 = smov 0   ;;  %s655_s0 = inlined_call_operand.vmem [shape: f32[2,2,32,128], index: 0, kind: input, shape index: {}]   ;;  %s656_s1 = inlined_call_operand.vmem [shape: s8[2,32,128], index: 1, kind: input, shape index: {}]   ;;  %s657_s2 = inlined_call_operand.vmem [shape: f32[2,3,8,128], index: 2, kind: output, shape index: {}]  }
   0x1   :  { %s545_s11 = smov 0  }
   0x2 LB: > { %s31_s12 = sadd.s32 1, %s519_s10  ;;  %p439_p0 = scmp.ge.s32.totalorder %s523_s11, 1  ;;  %s523_s11 = sphi %s545_s11, %s12_s11   ;;  %s519_s10 = sphi %s543_s10, %s669_s10   ;;  %s515_s9 = sphi %s541_s9, %s668_s9  }
   0x3   : > { %p33_p1 = scmp.ge.s32.totalorder %s31_s12, 2  ;;  %p162_p2 = scmp.lt.s32.totalorder %s523_s11, 3 }
   0x5   : > { %s671_s12 = smov (%p33_p1, %s31_s12), 0  ;;  %p163_p3 = pnand %p439_p0, %p162_p2 }
   0x6   : > { %p200_p4 = scmp.lt.s32.totalorder (!%p163_p3), %s515_s9, 1 }
   0x7   : > { %166 = sbr.rel (%p163_p3) target bundleno = 71 (0x47), region = 28 }
   0xc   : > { %s673_s9 = smov (!%p200_p4, %s515_s9), 1  ;;  %v525_v33 = vmov 0.0  }
   0xd   : > { %s458_s13 = sshll.u32 %s673_s9, 6  ;;  %s442_s17 = sshll.u32 %s673_s9, 3 }
   0xe   : > { %s207_s16 = scalar_lea.vmem %s655_s0, %s458_s13  ;;  %s217_s20 = scalar_lea.vmem %s656_s1, %s442_s17 }
   0xf   : > { %v233_v0 = vld [vmem:[%s207_s16] sm:$0xff]  ;;  %v234_v1 = vld [vmem:[%s207_s16 + $0x8] sm:$0xff]  ;;  %v235_v2 = vld [vmem:[%s207_s16 + $0x10] sm:$0xff]  ;;  %s459_s21 = smul.u32 24, %s673_s9 }
  0x10   : > { %v236_v3 = vld [vmem:[%s207_s16 + $0x18] sm:$0xff]  ;;  %v444_v4 = vld [vmem:[%s207_s16 + $0x20] sm:$0xff]  ;;  %v445_v5 = vld [vmem:[%s207_s16 + $0x28] sm:$0xff] }
  0x11   : > { %v446_v6 = vld [vmem:[%s207_s16 + $0x30] sm:$0xff]  ;;  %v447_v7 = vld [vmem:[%s207_s16 + $0x38] sm:$0xff]  ;;  %v569_v8 = vld [vmem:[%s217_s20] sm:$0xff]  ;;  %v252_v9 = vsub.f32 %v233_v0, %v444_v4  ;;  %v253_v10 = vsub.f32 %v234_v1, %v445_v5  ;;  %v256_v11 = vsub.f32 %v444_v4, %v233_v0  ;;  %v257_v12 = vsub.f32 %v445_v5, %v234_v1  ;;  %s619_s24 = scalar_lea.vmem %s657_s2, %s459_s21 }
  0x12   : > { %v244_v13 = vunpack.c.0.s8 %v569_v8  ;;  %v245_v14 = vunpack.c.1.s8 %v569_v8  ;;  %v246_v15 = vunpack.c.2.s8 %v569_v8  ;;  %v247_v16 = vunpack.c.3.s8 %v569_v8 }
  0x13   : > { %v254_v17 = vsub.f32 %v235_v2, %v446_v6  ;;  %v255_v18 = vsub.f32 %v236_v3, %v447_v7  ;;  %v258_v19 = vsub.f32 %v446_v6, %v235_v2  ;;  %v259_v20 = vsub.f32 %v447_v7, %v236_v3 }
  0x14   : > { %vm577_vm0 = vcmp.eq.s32.totalorder %v244_v13, 1  ;;  %vm583_vm1 = vcmp.eq.s32.totalorder %v245_v14, 1  ;;  %vm589_vm2 = vcmp.eq.s32.totalorder %v246_v15, 1  ;;  %vm595_vm3 = vcmp.eq.s32.totalorder %v247_v16, 1 }
  0x15   : > { %v260_v25 = vsel %vm577_vm0, %v252_v9, %v256_v11  ;;  %v261_v26 = vsel %vm583_vm1, %v253_v10, %v257_v12  ;;  %v262_v27 = vsel %vm589_vm2, %v254_v17, %v258_v19  ;;  %v263_v28 = vsel %vm595_vm3, %v255_v18, %v259_v20 }
  0x16   : > { %v268_v29 = vand.u32 2147483647, %v260_v25  ;;  %v269_v30 = vand.u32 2147483647, %v261_v26  ;;  %v270_v31 = vand.u32 2147483647, %v262_v27 }
  0x17   : > { %v271_v32 = vand.u32 2147483647, %v263_v28  ;;  %v448_v34 = vsel %vm577_vm0, 1.0, %v525_v33  ;;  %v449_v35 = vsel %vm583_vm1, 1.0, %v525_v33  ;;  %v450_v39 = vsel %vm589_vm2, 1.0, %v525_v33 }
  0x18   : > { %v272_v36 = vsub.f32 0.0, %v268_v29  ;;  %v273_v37 = vsub.f32 0.0, %v269_v30  ;;  %v274_v38 = vsub.f32 0.0, %v270_v31  ;;  %v451_v41 = vsel %vm595_vm3, 1.0, %v525_v33 }
  0x19   : > { %v275_v40 = vsub.f32 0.0, %v271_v32  ;;  %v320_v42 = vadd.f32 %v449_v35, %v448_v34  ;;  %v264_v57 = vmax.f32 %v260_v25, 0.0  ;;  %v265_v59 = vmax.f32 %v261_v26, 0.0 }
  0x1a   : > { %v276_v43 = vmul.f32 1.442695, %v272_v36  ;;  %v278_v44 = vmul.f32 1.442695, %v273_v37  ;;  %v280_v45 = vmul.f32 1.442695, %v274_v38 }
  0x1b   : > { %v282_v46 = vmul.f32 1.442695, %v275_v40  ;;  %v321_v47 = vadd.f32 %v450_v39, %v320_v42  ;;  %v266_v61 = vmax.f32 %v262_v27, 0.0  ;;  %v267_v0 = vmax.f32 %v263_v28, 0.0 }
  0x1c   : > { %485 = vpow2.f32 %v276_v43  ;;  %vm624_vm4 = vcmp.ge.s32.totalorder %v244_v13, 0  ;;  %vm301_vm5 = vcmp.ge.s32.totalorder %v245_v14, 0  ;;  %vm302_vm6 = vcmp.ge.s32.totalorder %v246_v15, 0 }
  0x1d   : > { %487 = vpow2.f32 %v278_v44  ;;  %v322_v48 = vadd.f32 %v451_v41, %v321_v47  ;;  %vm303_vm7 = vcmp.ge.s32.totalorder %v247_v16, 0 }
  0x1e   : > { %489 = vpow2.f32 %v280_v45 }
  0x1f   : > { %491 = vpow2.f32 %v282_v46  ;;  %334 = vst [vmem:[%s619_s24] sm:$0xff] %v322_v48 }
  0x29   : > { %v486_v49 = vpop.eup %485 }
  0x2a   : > { %v488_v50 = vpop.eup %487  ;;  %v284_v51 = vadd.f32 1.0, %v486_v49 }
  0x2b   : > { %v490_v52 = vpop.eup %489  ;;  %v285_v53 = vadd.f32 1.0, %v488_v50 }
  0x2c   : > { %v492_v54 = vpop.eup %491  ;;  %v286_v55 = vadd.f32 1.0, %v490_v52  ;;  %493 = vlog2.f32 %v284_v51 }
  0x2d   : > { %v287_v56 = vadd.f32 1.0, %v492_v54  ;;  %495 = vlog2.f32 %v285_v53 }
  0x2e   : > { %497 = vlog2.f32 %v286_v55 }
  0x2f   : > { %499 = vlog2.f32 %v287_v56 }
  0x39   : > { %v494_v58 = vpop.eup %493 }
  0x3a   : > { %v496_v60 = vpop.eup %495  ;;  %v289_v62 = vmul.f32 0.6931472, %v494_v58 }
  0x3b   : > { %v498_v63 = vpop.eup %497  ;;  %v291_v1 = vmul.f32 0.6931472, %v496_v60 }
  0x3c   : > { %v500_v3 = vpop.eup %499  ;;  %v293_v4 = vmul.f32 0.6931472, %v498_v63  ;;  %v296_v5 = vadd.f32 %v289_v62, %v264_v57 }
  0x3d   : > { %v295_v6 = vmul.f32 0.6931472, %v500_v3  ;;  %v297_v7 = vadd.f32 %v291_v1, %v265_v59 }
  0x3e   : > { %v298_v9 = vadd.f32 %v293_v4, %v266_v61  ;;  %v308_v10 = vsel %vm624_vm4, %v296_v5, 0.0  ;;  %v304_v11 = vsel %vm577_vm0, %v296_v5, 0.0 }
  0x3f   : > { %v299_v12 = vadd.f32 %v295_v6, %v267_v0  ;;  %v309_v13 = vsel %vm301_vm5, %v297_v7, 0.0  ;;  %v305_v14 = vsel %vm583_vm1, %v297_v7, 0.0 }
  0x40   : > { %v310_v17 = vsel %vm302_vm6, %v298_v9, 0.0  ;;  %v324_v18 = vadd.f32 %v309_v13, %v308_v10  ;;  %v306_v15 = vsel %vm589_vm2, %v298_v9, 0.0  ;;  %v328_v8 = vadd.f32 %v305_v14, %v304_v11 }
  0x41   : > { %v311_v16 = vsel %vm303_vm7, %v299_v12, 0.0  ;;  %v307_v19 = vsel %vm595_vm3, %v299_v12, 0.0 }
  0x42   : > { %v325_v20 = vadd.f32 %v324_v18, %v310_v17  ;;  %v329_v25 = vadd.f32 %v328_v8, %v306_v15 }
  0x44   : > { %v326_v21 = vadd.f32 %v325_v20, %v311_v16  ;;  %v330_v26 = vadd.f32 %v329_v25, %v307_v19 }
  0x46   : > { %453 = vst [vmem:[%s619_s24 + $0x8] sm:$0xff] %v326_v21  ;;  %455 = vst [vmem:[%s619_s24 + $0x10] sm:$0xff] %v330_v26 }
  0x47 PF: > { %s12_s11 = sadd.s32 1, %s523_s11   ;;  %s668_s9 = smov %s519_s10 }
  0x48   : > { %p9_p5 = scmp.ge.s32.totalorder %s12_s11, 4   ;;  %s669_s10 = smov %s671_s12 }
  0x4a   :  { %11 = sbr.rel (!%p9_p5) target bundleno = 2 (0x2), region = 68 }

</bundles_post_ra>
